<compile_context>
chip_gen: v5e
topology: v5e:2x2
jax: 0.10.0
libtpu: 0.0.40
codegen_flags: <defaults>
</compile_context>

<pallas_src>
import functools

import jax
import jax.numpy as jnp
from jax.experimental import pallas as pl
from jax.experimental.pallas import tpu as pltpu


# ----------------------------------------------------------------------------
# Interpolation-weight construction (plain JAX glue; deterministic, no params)
# ----------------------------------------------------------------------------
def _nearest_matrix(out_size: int, in_size: int, scale=None, dtype=jnp.float32):
    # PyTorch 'nearest': src = floor(dst * scale_inv) with scale_inv = 1/scale
    # when scale_factor was given, else in/out ratio (exact integer math).
    dst = jnp.arange(out_size)
    if scale is not None:
        src = jnp.floor(dst.astype(jnp.float32) * (1.0 / float(scale)))
        src = src.astype(jnp.int32)
    else:
        src = (dst * in_size) // out_size
    src = jnp.clip(src, 0, in_size - 1)
    return jax.nn.one_hot(src, in_size, dtype=dtype)  # (out_size, in_size)


def _bilinear_matrix(out_size: int, in_size: int, scale=None, dtype=jnp.float32):
    # PyTorch 'bilinear', align_corners=False (the nn.Upsample default).
    # When constructed with scale_factor (recompute_scale_factor False), torch
    # maps coordinates with 1/scale_factor, not in/out ratio.
    step = (1.0 / scale) if scale is not None else (in_size / out_size)
    dst = jnp.arange(out_size, dtype=jnp.float32)
    src = (dst + 0.5) * step - 0.5
    src = jnp.clip(src, 0.0, in_size - 1)
    lo = jnp.floor(src).astype(jnp.int32)
    hi = jnp.minimum(lo + 1, in_size - 1)
    frac = src - lo.astype(jnp.float32)
    w_lo = jax.nn.one_hot(lo, in_size, dtype=jnp.float32) * (1.0 - frac)[:, None]
    w_hi = jax.nn.one_hot(hi, in_size, dtype=jnp.float32) * frac[:, None]
    return (w_lo + w_hi).astype(dtype)  # (out_size, in_size)


def _interp_matrix(mode: str, out_size: int, in_size: int, scale=None,
                   dtype=jnp.float32):
    if mode == "nearest":
        return _nearest_matrix(out_size, in_size, scale, dtype)
    if mode in ("bilinear", "linear"):
        return _bilinear_matrix(out_size, in_size, scale, dtype)
    raise NotImplementedError(f"mode={mode!r}")


# ----------------------------------------------------------------------------
# Block-size (planes per grid step) selection from a VMEM budget
# ----------------------------------------------------------------------------
def _pick_tn(N, H, W, H_out, W_out, x_itemsize, w_itemsize,
             budget_bytes=20 * 1024 * 1024, max_tn=512):
    per_plane = (
        2 * H * W * x_itemsize                      # double-buffered input block
        + 2 * H_out * W_out * x_itemsize            # double-buffered output block
        + 4 * H * W                                 # input cast to compute dtype
        + 4 * max(H_out * W, W_out * H)             # f32 intermediate
        + w_itemsize * max(H_out * W, W_out * H)    # intermediate cast copy
        + 4 * H_out * W_out                         # f32 result before final cast
        + w_itemsize * (H_out * H + W_out * W)      # broadcast weight copies
    )
    cap = max(1, min(N, max_tn, budget_bytes // per_plane))
    divs = [d for d in range(1, cap + 1) if N % d == 0]
    tn = divs[-1]
    # Keep >= 2 grid steps when possible without making blocks tiny, so the
    # "parallel" grid axis can split across v7x's two TensorCores.
    if N // tn < 2:
        for d in reversed(divs[:-1]):
            if 2 * d >= tn:
                tn = d
                break
    return tn


# ----------------------------------------------------------------------------
# Pallas kernel: TN planes per step, out[n] = A @ x[n] @ B^T.
#   merged=True : H-interp as one batched 'bqk,bkd->bqd' matmul, W-interp as a
#                 single big (TN*H_out, W) @ (W, W_out) matmul.
#   merged=False: both steps as batched 'bqd,bkd->bqk' matmuls (any shape).
# ----------------------------------------------------------------------------
def _upsample_kernel(a_ref, b_ref, x_ref, o_ref, *, merged):
    cdt = a_ref.dtype
    x = x_ref[...].astype(cdt)                      # (TN, H, W)
    a = a_ref[...]                                  # (H_out, H)
    tn, _, w_in = x.shape
    h_out = a.shape[0]
    a_b = jnp.broadcast_to(a, (tn,) + a.shape)      # (TN, H_out, H)

    if merged:
        b_t = b_ref[...]                            # (W, W_out)
        # H-interp: v[n, h', w] = sum_h A[h', h] x[n, h, w]
        v = jnp.einsum("bqk,bkd->bqd", a_b, x,
                       preferred_element_type=jnp.float32)          # (TN, H_out, W)
        # W-interp as one large 2-D matmul; reshapes are free when H_out % 8 == 0.
        v2 = v.astype(cdt).reshape(tn * h_out, w_in)                 # (TN*H_out, W)
        o2 = jnp.dot(v2, b_t, preferred_element_type=jnp.float32)    # (TN*H_out, W_out)
        o_ref[...] = o2.reshape(o_ref.shape).astype(o_ref.dtype)
    else:
        b = b_ref[...]                              # (W_out, W)
        b_b = jnp.broadcast_to(b, (tn,) + b.shape)  # (TN, W_out, W)
        # W-interp: u[n, w', h] = sum_w B[w', w] x[n, h, w]
        u = jnp.einsum("bqd,bkd->bqk", b_b, x,
                       preferred_element_type=jnp.float32)           # (TN, W_out, H)
        # H-interp: o[n, h', w'] = sum_h A[h', h] u[n, w', h]
        o = jnp.einsum("bqd,bkd->bqk", a_b, u.astype(cdt),
                       preferred_element_type=jnp.float32)           # (TN, H_out, W_out)
        o_ref[...] = o.astype(o_ref.dtype)


def upsample(x, *, size=None, scale_factor=None, mode="nearest"):
    """x: (B, C, H, W) float array. Returns (B, C, H_out, W_out)."""
    B, C, H, W = x.shape
    if size is not None:
        H_out, W_out = (size, size) if isinstance(size, int) else tuple(size)
        h_scale = w_scale = None
    else:
        sh, sw = scale_factor
        H_out, W_out = int(H * sh), int(W * sw)
        h_scale, w_scale = float(sh), float(sw)

    # Weight dtype: nearest weights are exact one-hot -> bf16 is lossless and
    # keeps the MXU at native rate for bf16 inputs. Bilinear stays f32.
    if mode == "nearest" and x.dtype == jnp.bfloat16:
        wdt = jnp.bfloat16
    else:
        wdt = jnp.float32

    A = _interp_matrix(mode, H_out, H, scale=h_scale, dtype=wdt)    # (H_out, H)
    Bw = _interp_matrix(mode, W_out, W, scale=w_scale, dtype=wdt)   # (W_out, W)

    # Merged path needs free (TN, H_out, W) <-> (TN*H_out, W) reshapes.
    merged = (H_out % 8 == 0)
    b_arr = Bw.T if merged else Bw     # (W, W_out) for merged, (W_out, W) otherwise

    N = B * C
    x_flat = x.reshape(N, H, W)

    tn = _pick_tn(N, H, W, H_out, W_out,
                  jnp.dtype(x.dtype).itemsize, jnp.dtype(wdt).itemsize)
    grid = (N // tn,)

    kernel = functools.partial(_upsample_kernel, merged=merged)

    out_flat = pl.pallas_call(
        kernel,
        out_shape=jax.ShapeDtypeStruct((N, H_out, W_out), x.dtype),
        grid_spec=pltpu.PrefetchScalarGridSpec(
            num_scalar_prefetch=0,
            grid=grid,
            in_specs=[
                pl.BlockSpec(tuple(A.shape), lambda n: (0, 0)),
                pl.BlockSpec(tuple(b_arr.shape), lambda n: (0, 0)),
                pl.BlockSpec((tn, H, W), lambda n: (n, 0, 0)),
            ],
            out_specs=pl.BlockSpec((tn, H_out, W_out), lambda n: (n, 0, 0)),
        ),
        compiler_params=pltpu.CompilerParams(
            dimension_semantics=("parallel",),
            # Raise v5e's 16 MiB scoped default; 32 MiB is safe on v6e/v7x too.
            vmem_limit_bytes=32 * 1024 * 1024,
        ),
    )(A, b_arr, x_flat)

    return out_flat.reshape(B, C, H_out, W_out)


# ----------------------------------------------------------------------------
# UpSampling module equivalent
# ----------------------------------------------------------------------------
class UpSampling:
    def __init__(self, size, scale_factor, mode, *args, **kwargs):
        self.size = size
        self.scale_factor = tuple(scale_factor) if scale_factor is not None else None
        self.mode = mode

    def __call__(self, x):
        return upsample(x, size=self.size, scale_factor=self.scale_factor,
                        mode=self.mode)


if __name__ == "__main__":
    key = jax.random.PRNGKey(0)
    B, C, H, W = 2, 4, 16, 16
    x = jax.random.normal(key, (B, C, H, W), dtype=jnp.float32)

    # Matches: UpSampling(size=None, scale_factor=(2, 2), mode='nearest')
    mod = UpSampling(size=None, scale_factor=(2, 2), mode="nearest")
    y = jax.block_until_ready(mod(x))
    assert y.shape == (B, C, 2 * H, 2 * W)

    # Independent reference for nearest: out[..., i, j] == x[..., i // 2, j // 2]
    ii = jnp.arange(2 * H) // 2
    jj = jnp.arange(2 * W) // 2
    ref = x[:, :, ii, :][:, :, :, jj]
    assert jnp.allclose(y, ref, atol=1e-6), "nearest upsample mismatch"

    # Bilinear path: compare against an independent gather/lerp reference
    # (half-pixel centers, align_corners=False, 1/scale coordinate mapping).
    mod_bi = UpSampling(size=None, scale_factor=(2, 2), mode="bilinear")
    y_bi = jax.block_until_ready(mod_bi(x))
    assert y_bi.shape == (B, C, 2 * H, 2 * W)

    def lin_coords(out_n, in_n, scale):
        src = (jnp.arange(out_n, dtype=jnp.float32) + 0.5) / scale - 0.5
        src = jnp.clip(src, 0.0, in_n - 1)
        lo = jnp.floor(src).astype(jnp.int32)
        hi = jnp.minimum(lo + 1, in_n - 1)
        return lo, hi, src - lo

    hlo, hhi, hf = lin_coords(2 * H, H, 2.0)
    wlo, whi, wf = lin_coords(2 * W, W, 2.0)
    top = (x[:, :, hlo, :] * (1.0 - hf)[None, None, :, None]
           + x[:, :, hhi, :] * hf[None, None, :, None])
    ref_bi = top[:, :, :, wlo] * (1.0 - wf) + top[:, :, :, whi] * wf
    assert jnp.allclose(y_bi, ref_bi, atol=1e-5), "bilinear upsample mismatch"

    print("KERNEL_OK")
</pallas_src>

<mosaic_0001>
module attributes {stable_mosaic.version = 11 : i64} {
  func.func @_upsample_kernel(%arg0: i32, %arg1: memref<32x16xf32, #tpu.memory_space<vmem>>, %arg2: memref<16x32xf32, #tpu.memory_space<vmem>>, %arg3: memref<4x16x16xf32, #tpu.memory_space<vmem>>, %arg4: memref<4x32x32xf32, #tpu.memory_space<vmem>>) attributes {dimension_semantics = [#tpu.dimension_semantics<parallel>], iteration_bounds = array<i64: 2>, scalar_prefetch = 0 : i64, scratch_operands = 0 : i64, tpu.core_type = #tpu.core_type<tc>, window_params = [{pipeline_mode = #tpu.pipeline_mode<synchronous>, transform_indices = @transform_0, window_bounds = array<i64: 32, 16>}, {pipeline_mode = #tpu.pipeline_mode<synchronous>, transform_indices = @transform_1, window_bounds = array<i64: 16, 32>}, {transform_indices = @transform_2, window_bounds = array<i64: 4, 16, 16>}, {transform_indices = @transform_3, window_bounds = array<i64: 4, 32, 32>}]} {
    %c0 = arith.constant 0 : index
    %c0_0 = arith.constant 0 : index
    %c0_1 = arith.constant 0 : index
    %0 = vector.load %arg3[%c0, %c0_0, %c0_1] : memref<4x16x16xf32, #tpu.memory_space<vmem>>, vector<4x16x16xf32>
    %c0_2 = arith.constant 0 : index
    %c0_3 = arith.constant 0 : index
    %1 = vector.load %arg1[%c0_2, %c0_3] : memref<32x16xf32, #tpu.memory_space<vmem>>, vector<32x16xf32>
    %2 = vector.shape_cast %1 : vector<32x16xf32> to vector<1x32x16xf32>
    %3 = vector.broadcast %2 : vector<1x32x16xf32> to vector<4x32x16xf32>
    %c0_4 = arith.constant 0 : index
    %c0_5 = arith.constant 0 : index
    %4 = vector.load %arg2[%c0_4, %c0_5] : memref<16x32xf32, #tpu.memory_space<vmem>>, vector<16x32xf32>
    "tpu.trace_start"() <{level = 10 : i32, message = "bqk,bkd->bqd"}> : () -> ()
    %cst = arith.constant dense<0.000000e+00> : vector<4x32x16xf32>
    %5 = tpu.matmul %3, %0, %cst {dimension_numbers = #tpu.dot_dimension_numbers<[2], [1], [1], [2], [0, 0, 0, 1, 1, 2], [0], [0]>} : vector<4x32x16xf32>, vector<4x16x16xf32>, vector<4x32x16xf32> -> vector<4x32x16xf32>
    "tpu.trace_stop"() : () -> ()
    %6 = vector.shape_cast %5 : vector<4x32x16xf32> to vector<128x16xf32>
    %cst_6 = arith.constant dense<0.000000e+00> : vector<128x32xf32>
    %7 = tpu.matmul %6, %4, %cst_6 {dimension_numbers = #tpu.dot_dimension_numbers<[1], [0], [0], [1], [0, 0, 1, 1], [], []>} : vector<128x16xf32>, vector<16x32xf32>, vector<128x32xf32> -> vector<128x32xf32>
    %8 = vector.shape_cast %7 : vector<128x32xf32> to vector<4x32x32xf32>
    %c0_7 = arith.constant 0 : index
    %c0_8 = arith.constant 0 : index
    %c0_9 = arith.constant 0 : index
    %9 = vector.load %arg4[%c0_7, %c0_8, %c0_9] : memref<4x32x32xf32, #tpu.memory_space<vmem>>, vector<4x32x32xf32>
    tpu.vector_store %arg4[%c0_7, %c0_8, %c0_9], %8 {strides = array<i32>} : memref<4x32x32xf32, #tpu.memory_space<vmem>>, vector<4x32x32xf32>,
    return
  }
  func.func @transform_0(%arg0: i32) -> (i32, i32) {
    %c0_i32 = arith.constant 0 : i32
    %c0_i32_0 = arith.constant 0 : i32
    %c0_i32_1 = arith.constant 0 : i32
    return %c0_i32, %c0_i32_0 : i32, i32
  }
  func.func @transform_1(%arg0: i32) -> (i32, i32) {
    %c0_i32 = arith.constant 0 : i32
    %c0_i32_0 = arith.constant 0 : i32
    %c0_i32_1 = arith.constant 0 : i32
    return %c0_i32, %c0_i32_0 : i32, i32
  }
  func.func @transform_2(%arg0: i32) -> (i32, i32, i32) {
    %c0_i32 = arith.constant 0 : i32
    %c0_i32_0 = arith.constant 0 : i32
    %c0_i32_1 = arith.constant 0 : i32
    return %arg0, %c0_i32, %c0_i32_0 : i32, i32, i32
  }
  func.func @transform_3(%arg0: i32) -> (i32, i32, i32) {
    %c0_i32 = arith.constant 0 : i32
    %c0_i32_0 = arith.constant 0 : i32
    %c0_i32_1 = arith.constant 0 : i32
    return %arg0, %c0_i32, %c0_i32_0 : i32, i32, i32
  }
}

</mosaic_0001>

<bundles_post_ra>
// kernel: tpu_custom_call.1
= control target key start
LH: loop header
LB: loop body
LE: loop exit
PB: predicated region body
PF: predicated region fallthrough
CT: control target
= control target key end

     0   :  { %8 = vsyncpa [#allocation3], 0  ;;  %s996_s0 = inlined_call_operand.vmem [shape: f32[32,16], index: 0, kind: input, shape index: {}]   ;;  %s997_s1 = inlined_call_operand.vmem [shape: f32[16,32], index: 1, kind: input, shape index: {}]   ;;  %s998_s2 = inlined_call_operand.hbm [shape: f32[8,16,16], index: 2, kind: input, shape index: {}]   ;;  %s999_s3 = inlined_call_operand.hbm [shape: f32[8,32,32], index: 3, kind: output, shape index: {}]  }
   0x1   :  { %10 = vsyncpa [#allocation3 + $0x1], 0 }
   0x2   :  { %11 = vsyncpa [#allocation4], 0 }
   0x3   :  { %13 = vsyncpa [#allocation4 + $0x1], 0  ;;  %s783_s12 = smov 0   ;;  %s785_s13 = smov 0  }
   0x4   :  { %s787_s14 = smov 0   ;;  %s789_s15 = smov 0  }
   0x5 LB: > { %s804_s16 = sadd.s32 4294967295, %s757_s15   ;;  %s557_s17 = sadd.s32 4294967294, %s757_s15   ;;  %s757_s15 = sphi %s789_s15, %s1009_s15   ;;  %s753_s14 = sphi %s787_s14, %s1008_s14   ;;  %s749_s13 = sphi %s785_s13, %s1007_s13   ;;  %s745_s12 = sphi %s783_s12, %s1006_s12  }
   0x6   : > { %s808_s18 = sadd.s32 1, %s757_s15   ;;  %s68_s19 = sadd.s32 1, %s753_s14 }
   0x7   : > { %s65_s20 = ssub.s32 %s757_s15, %s808_s18  ;;  %p75_p0 = scmp.ne.s32.totalorder %s753_s14, %s749_s13 }
   0x8   : > { %p66_p1 = scmp.eq.s32.totalorder %s65_s20, 0  ;;  %p76_p2 = scmp.eq.s32.totalorder %s757_s15, 0 }
   0x9   : > { %p81_p3 = scmp.ne.s32.totalorder %s749_s13, %s745_s12  ;;  %p82_p4 = scmp.eq.s32.totalorder %s804_s16, 0 }
   0xa   : > { %s820_s21 = scalar_select %p66_p1, %s753_s14, %s68_s19  }
   0xb   : > { %p822_p5 = por %p76_p2, %p75_p0  ;;  %p826_p6 = por %p82_p4, %p81_p3 }
   0xc   : > { %p105_p7 = scmp.eq.s32.totalorder %s804_s16, 1  ;;  %p111_p8 = scmp.eq.s32.totalorder %s557_s17, 1 }
   0xd   : > { %p623_p10 = scmp.lt.s32.totalorder %s757_s15, 2  ;;  %s137_s26 = sand.u32 1, %s753_s14  }
   0xe   : > { %p833_p11 = por %p105_p7, %p75_p0  ;;  %p837_p12 = por %p111_p8, %p81_p3 }
   0xf   : > { %s606_s27 = sshll.u32 %s757_s15, 6  ;;  %s560_s28 = sshll.u32 %s137_s26, 6 }
  0x10   : > { %s147_s4 = scalar_lea.hbm %s998_s2, %s606_s27  ;;  %s141_s6 = scalar_lea.vmem [#allocation2], %s560_s28 }
  0x11   : > { %s148_s5 = sshll.u32 %s147_s4, 4  ;;  %s150_s7 = sshll.u32 %s141_s6, 4  ;;  %s149_s5 = int_to_ptr.hbm [resolvable:$true] %s148_s5  ;;  %s151_s7 = int_to_ptr.vmem [resolvable:$true] %s150_s7 }
  0x12   : > { %p848_p13 = pnand %p623_p10, %p822_p5  ;;  %p564_p0 = scmp.ge.s32.totalorder %s757_s15, 1 }
  0x13   : > { %p158_p1 = scmp.lt.s32.totalorder %s757_s15, 3  ;;  %s138_s9 = scalar_lea.sflag [#allocation3], %s137_s26 }
  0x14   : > { %s661_s10 = sshra.s32 %s149_s5, 4  ;;  %p665_p3 = pneg %p848_p13  ;;  %s662_s10 = int_to_ptr.hbm [resolvable:$true] %s661_s10 }
  0x15   : > { %s663_s11 = scalar_lea.hbm %s662_s10, 64  ;;  %s668_s20 = scalar_lea.hbm %s998_s2, 128 }
  0x16   : > { %p664_p2 = scmp.ne.s32.totalorder %s662_s10, %s663_s11  ;;  %p669_p5 = scmp.lt.s32.totalorder %s662_s10, %s998_s2 }
  0x17   : > { %p670_p8 = scmp.lt.s32.totalorder %s668_s20, %s663_s11 }
  0x18   : > { %p666_p4 = pnand %p665_p3, %p664_p2 }
  0x19   : > { %p671_p10 = por %p670_p8, %p669_p5 }
  0x1a   : > { %p667_p7 = pneg %p666_p4 }
  0x1c   : > { %p672_p9 = pnand %p671_p10, %p667_p7 }
  0x1e   : > { %675 = shalt.err (!%p672_p9)
}
  0x1f   : > { %s759_s26 = smov 128   ;;  %s760_s28 = smov 8  }
  0x20   : > { %618 = dma.hbm_to_vmem [thread:$0]  (!%p848_p13), %s149_s5, 1024, %s151_s7, %s138_s9, %s759_s26, %s759_s26, %s760_s28  }
  0x21   : > { %p159_p2 = pnand %p564_p0, %p158_p1 }
  0x22   : > { %s869_s29 = sand.u32 (!%p159_p2), 1, %s749_s13  }
  0x23   : > { %162 = sbr.rel (%p159_p2) target bundleno = 369 (0x171), region = 32  ;;  %s565_s30 = sshll.u32 (!%p159_p2), %s869_s29, 6 }
  0x24   : > { %s165_s4 = scalar_lea.sflag (!%p159_p2), [#allocation3], %s869_s29  ;;  %s168_s6 = scalar_lea.vmem (!%p159_p2), [#allocation2], %s565_s30 }
  0x28   : > { %736 = dma.done.wait (%p826_p6), %s165_s4, 1024  }
  0x29   : > { %738 = vsyncadd (%p826_p6), %s165_s4, 4294966272  ;;  %v199_v0 = vld [vmem:[%s168_s6 + $0x28] sm:$0xff]  ;;  %v198_v1 = vld [vmem:[%s168_s6 + $0x20] sm:$0xff]  ;;  %vm208_vm0 = vcmask 130048   ;;  %s566_s26 = sshll.u32 %s869_s29, 7  ;;  %vm450_vm1 = vcmask 261120  }
  0x2a   : > { %293 = vmatpush.msra.mxu3 %v199_v0  ;;  %v202_v2 = vld [vmem:[%s996_s0] sm:$0xff]  ;;  %v195_v3 = vld [vmem:[%s168_s6 + $0x8] sm:$0xff]  ;;  %v201_v4 = vld [vmem:[%s168_s6 + $0x38] sm:$0xff]  ;;  %s928_s28 = scalar_lea.vmem [#allocation5], %s566_s26  ;;  %s608_s30 = sshll.u32 %s804_s16, 7 }
  0x2b   : > { %235 = vmatpush.msra.mxu1 %v195_v3  ;;  %v194_v5 = vld [vmem:[%s168_s6] sm:$0xff]  ;;  %v197_v6 = vld [vmem:[%s168_s6 + $0x18] sm:$0xff]  ;;  %v200_v7 = vld [vmem:[%s168_s6 + $0x30] sm:$0xff]  ;;  %s480_s5 = scalar_lea.hbm %s999_s3, %s608_s30  ;;  %s481_s7 = sshll.u32 %s928_s28, 4  ;;  %s482_s7 = int_to_ptr.vmem [resolvable:$true] %s481_s7 }
  0x2c   : > { %294 = vmatpush.msra.mxu3 %v198_v1  ;;  %v196_v8 = vld [vmem:[%s168_s6 + $0x10] sm:$0xff]  ;;  %v203_v9 = vld [vmem:[%s996_s0 + $0x8] sm:$0xff]  ;;  %v205_v11 = vld [vmem:[%s996_s0 + $0x18] sm:$0xff]  ;;  %s483_s23 = sshll.u32 %s480_s5, 4  ;;  %s468_s8 = scalar_lea.sflag [#allocation4], %s869_s29  ;;  %s484_s23 = int_to_ptr.hbm [resolvable:$true] %s483_s23 }
  0x2d   : > { %575 = vmatmul.msk.f32.vlgmr.msra.gmra.mxu3 %vm208_vm0, %v202_v2  ;;  %236 = vmatpush.msra.mxu1 %v194_v5  ;;  %v204_v10 = vld [vmem:[%s996_s0 + $0x10] sm:$0xff]  ;;  %v207_v12 = vld [vmem:[%s997_s1 + $0x8] sm:$0xff]  ;;  %v206_v13 = vld [vmem:[%s997_s1] sm:$0xff]  ;;  %s705_s9 = sshra.s32 %s484_s23, 4  ;;  %s711_s17 = scalar_lea.hbm %s999_s3, 256  ;;  %s706_s9 = int_to_ptr.hbm [resolvable:$true] %s705_s9 }
  0x2e   : > { %322 = vmatpush.msrb.mxu3 %v201_v4  ;;  %567 = vmatmul.msk.f32.vlgmr.msra.gmra.mxu1 %vm208_vm0, %v202_v2  ;;  %s707_s16 = scalar_lea.hbm %s706_s9, 128  ;;  %p712_p0 = scmp.lt.s32.totalorder %s706_s9, %s999_s3 }
  0x2f   : > { %264 = vmatpush.msrb.mxu1 %v197_v6  ;;  %609 = vmatpush.msra.mxu2 %v207_v12  ;;  %p708_p6 = scmp.ne.s32.totalorder %s706_s9, %s707_s16  ;;  %p713_p1 = scmp.lt.s32.totalorder %s711_s17, %s707_s16 }
  0x30   : > { %323 = vmatpush.msrb.mxu3 %v200_v7  ;;  %399 = vmatpush.msra.mxu0 %v207_v12 }
  0x31   : > { %265 = vmatpush.msrb.mxu1 %v196_v8  ;;  %610 = vmatpush.msra.mxu2 %v206_v13  ;;  %p709_p9 = pnand %p708_p6, %p833_p11  ;;  %p714_p3 = por %p713_p1, %p712_p0 }
  0x32   : > { %400 = vmatpush.msra.mxu0 %v206_v13 }
  0x33   : > { %p710_p13 = pneg %p709_p9 }
  0x35   : > { %576 = vmatmul.msk.f32.gmra.mxu3 %vm208_vm0, %v203_v9  ;;  %p715_p4 = pnand %p714_p3, %p710_p13 }
  0x36   : > { %568 = vmatmul.msk.f32.gmra.mxu1 %vm208_vm0, %v203_v9 }
  0x3d   : > { %577 = vmatmul.msk.f32.gmra.mxu3 %vm208_vm0, %v204_v10 }
  0x3e   : > { %569 = vmatmul.msk.f32.gmra.mxu1 %vm208_vm0, %v204_v10 }
  0x45   : > { %578 = vmatmul.msk.f32.gmra.mxu3 %vm208_vm0, %v205_v11 }
  0x46   : > { %570 = vmatmul.msk.f32.gmra.mxu1 %vm208_vm0, %v205_v11 }
  0x4d   : > { %579 = vmatmul.msk.f32.vlgmr.msrb.gmra.mxu3 %vm208_vm0, %v202_v2 }
  0x4e   : > { %571 = vmatmul.msk.f32.vlgmr.msrb.gmra.mxu1 %vm208_vm0, %v202_v2 }
  0x55   : > { %580 = vmatmul.msk.f32.gmra.mxu3 %vm208_vm0, %v203_v9 }
  0x56   : > { %572 = vmatmul.msk.f32.gmra.mxu1 %vm208_vm0, %v203_v9 }
  0x5d   : > { %581 = vmatmul.msk.f32.gmra.mxu3 %vm208_vm0, %v204_v10 }
  0x5e   : > { %573 = vmatmul.msk.f32.gmra.mxu1 %vm208_vm0, %v204_v10 }
  0x65   : > { %582 = vmatmul.msk.f32.gmra.mxu3 %vm208_vm0, %v205_v11 }
  0x66   : > { %574 = vmatmul.msk.f32.gmra.mxu1 %vm208_vm0, %v205_v11 }
  0xab   : > { %v238_v14 = vpop.f32.mrf.mxu1 }
  0xac   : > { %583 = vmatmul.msk.f32.vlgmr.msra.gmra.mxu0 %vm208_vm0, %v238_v14 }
  0xb0   : > { %v296_v15 = vpop.f32.mrf.mxu3 }
  0xb1   : > { %591 = vmatmul.msk.f32.vlgmr.msra.gmra.mxu2 %vm208_vm0, %v296_v15 }
  0xb3   : > { %v241_v16 = vpop.f32.mrf.mxu1 }
  0xb4   : > { %584 = vmatmul.msk.f32.gmra.mxu0 %vm208_vm0, %v241_v16 }
  0xb8   : > { %v299_v17 = vpop.f32.mrf.mxu3 }
  0xb9   : > { %592 = vmatmul.msk.f32.gmra.mxu2 %vm208_vm0, %v299_v17 }
  0xbb   : > { %v244_v18 = vpop.f32.mrf.mxu1 }
  0xbc   : > { %585 = vmatmul.msk.f32.gmra.mxu0 %vm208_vm0, %v244_v18 }
  0xc0   : > { %v302_v19 = vpop.f32.mrf.mxu3 }
  0xc1   : > { %593 = vmatmul.msk.f32.gmra.mxu2 %vm208_vm0, %v302_v19 }
  0xc3   : > { %v247_v20 = vpop.f32.mrf.mxu1 }
  0xc4   : > { %586 = vmatmul.msk.f32.gmra.mxu0 %vm208_vm0, %v247_v20 }
  0xc8   : > { %v305_v21 = vpop.f32.mrf.mxu3 }
  0xc9   : > { %594 = vmatmul.msk.f32.gmra.mxu2 %vm208_vm0, %v305_v21 }
  0xcb   : > { %v267_v22 = vpop.f32.mrf.mxu1 }
  0xcc   : > { %587 = vmatmul.msk.f32.gmra.mxu0 %vm208_vm0, %v267_v22 }
  0xd0   : > { %v325_v23 = vpop.f32.mrf.mxu3 }
  0xd1   : > { %595 = vmatmul.msk.f32.gmra.mxu2 %vm208_vm0, %v325_v23 }
  0xd3   : > { %v270_v24 = vpop.f32.mrf.mxu1 }
  0xd4   : > { %588 = vmatmul.msk.f32.gmra.mxu0 %vm208_vm0, %v270_v24 }
  0xd8   : > { %v328_v25 = vpop.f32.mrf.mxu3 }
  0xd9   : > { %596 = vmatmul.msk.f32.gmra.mxu2 %vm208_vm0, %v328_v25 }
  0xdb   : > { %v273_v26 = vpop.f32.mrf.mxu1 }
  0xdc   : > { %589 = vmatmul.msk.f32.gmra.mxu0 %vm208_vm0, %v273_v26 }
  0xe0   : > { %v331_v27 = vpop.f32.mrf.mxu3 }
  0xe1   : > { %597 = vmatmul.msk.f32.gmra.mxu2 %vm208_vm0, %v331_v27 }
  0xe3   : > { %v276_v28 = vpop.f32.mrf.mxu1 }
  0xe4   : > { %590 = vmatmul.msk.f32.gmra.mxu0 %vm208_vm0, %v276_v28 }
  0xe8   : > { %v334_v29 = vpop.f32.mrf.mxu3 }
  0xe9   : > { %598 = vmatmul.msk.f32.gmra.mxu2 %vm208_vm0, %v334_v29 }
 0x129   : > { %v402_v30 = vpop.f32.mrf.mxu0 }
 0x12a   : > { %451 = vst.msk [vmem:[%s928_s28] sm:$0xff] %vm450_vm1, %v402_v30 }
 0x131   : > { %v405_v31 = vpop.f32.mrf.mxu0 }
 0x132   : > { %452 = vst.msk [vmem:[%s928_s28 + $0x8] sm:$0xff] %vm450_vm1, %v405_v31 }
 0x134   : > { %v426_v32 = vpop.f32.mrf.mxu2 }
 0x135   : > { %459 = vst.msk [vmem:[%s928_s28 + $0x40] sm:$0xff] %vm450_vm1, %v426_v32 }
 0x139   : > { %v408_v33 = vpop.f32.mrf.mxu0 }
 0x13a   : > { %453 = vst.msk [vmem:[%s928_s28 + $0x10] sm:$0xff] %vm450_vm1, %v408_v33 }
 0x13c   : > { %v429_v34 = vpop.f32.mrf.mxu2 }
 0x13d   : > { %460 = vst.msk [vmem:[%s928_s28 + $0x48] sm:$0xff] %vm450_vm1, %v429_v34 }
 0x141   : > { %v411_v35 = vpop.f32.mrf.mxu0 }
 0x142   : > { %454 = vst.msk [vmem:[%s928_s28 + $0x18] sm:$0xff] %vm450_vm1, %v411_v35 }
 0x144   : > { %v432_v36 = vpop.f32.mrf.mxu2 }
 0x145   : > { %461 = vst.msk [vmem:[%s928_s28 + $0x50] sm:$0xff] %vm450_vm1, %v432_v36 }
 0x149   : > { %v414_v37 = vpop.f32.mrf.mxu0 }
 0x14a   : > { %455 = vst.msk [vmem:[%s928_s28 + $0x20] sm:$0xff] %vm450_vm1, %v414_v37 }
 0x14c   : > { %v435_v38 = vpop.f32.mrf.mxu2 }
 0x14d   : > { %462 = vst.msk [vmem:[%s928_s28 + $0x58] sm:$0xff] %vm450_vm1, %v435_v38 }
 0x151   : > { %v417_v39 = vpop.f32.mrf.mxu0 }
 0x152   : > { %456 = vst.msk [vmem:[%s928_s28 + $0x28] sm:$0xff] %vm450_vm1, %v417_v39 }
 0x154   : > { %v438_v40 = vpop.f32.mrf.mxu2 }
 0x155   : > { %463 = vst.msk [vmem:[%s928_s28 + $0x60] sm:$0xff] %vm450_vm1, %v438_v40 }
 0x159   : > { %v420_v41 = vpop.f32.mrf.mxu0 }
 0x15a   : > { %457 = vst.msk [vmem:[%s928_s28 + $0x30] sm:$0xff] %vm450_vm1, %v420_v41 }
 0x15c   : > { %v441_v42 = vpop.f32.mrf.mxu2 }
 0x15d   : > { %464 = vst.msk [vmem:[%s928_s28 + $0x68] sm:$0xff] %vm450_vm1, %v441_v42 }
 0x161   : > { %v423_v43 = vpop.f32.mrf.mxu0 }
 0x162   : > { %458 = vst.msk [vmem:[%s928_s28 + $0x38] sm:$0xff] %vm450_vm1, %v423_v43 }
 0x164   : > { %v444_v44 = vpop.f32.mrf.mxu2 }
 0x165   : > { %465 = vst.msk [vmem:[%s928_s28 + $0x70] sm:$0xff] %vm450_vm1, %v444_v44 }
 0x16c   : > { %v447_v45 = vpop.f32.mrf.mxu2 }
 0x16d   : > { %466 = vst.msk [vmem:[%s928_s28 + $0x78] sm:$0xff] %vm450_vm1, %v447_v45 }
 0x16e   : > { %718 = shalt.err (!%p715_p4)
}
 0x16f   : > { %s761_s29 = smov 128   ;;  %s762_s22 = smov 8  }
 0x170   : > { %613 = dma.vmem_to_hbm [thread:$0]  (%p833_p11), %s482_s7, 2048, %s484_s23, %s468_s8, %s761_s29, %s761_s29, %s762_s22  }
 0x171 PF: > { %s498_s27 = sand.u32 1, %s745_s12   ;;  %p1005_p7 = scmp.ge.s32.totalorder %s757_s15, 2 }
 0x172   : > { %s499_s26 = scalar_lea.sflag [#allocation4], %s498_s27 }
 0x173   : > { %p620_p5 = pnand %p1005_p7, %p837_p12 }
 0x175   : > { %p621_p8 = pneg %p620_p5 }
 0x177   : > { %740 = dma.done.wait (%p621_p8), %s499_s26, 2048  }
 0x178   : > { %742 = vsyncadd (%p621_p8), %s499_s26, 4294965248  ;;  %p16_p10 = scmp.ge.s32.totalorder %s808_s18, 4   ;;  %s1006_s12 = smov %s749_s13 }
 0x179   : > { %s1007_s13 = smov %s753_s14  ;;  %s1008_s14 = smov %s820_s21 }
 0x17a   : > { %s1009_s15 = smov %s808_s18  ;;  %18 = sbr.rel (!%p16_p10) target bundleno = 5 (0x5), region = 77 }
 0x17f   :  { %505 = vsyncpa [#allocation3], 1 }
 0x180   :  { %507 = vsyncpa [#allocation3 + $0x1], 1 }
 0x181   :  { %508 = vsyncpa [#allocation4], 1 }
 0x182   :  { %510 = vsyncpa [#allocation4 + $0x1], 1 }

</bundles_post_ra>
